<compile_context>
chip_gen: v5e
topology: v5e:2x2
jax: 0.10.0
libtpu: 0.0.40
codegen_flags: <defaults>
</compile_context>

<pallas_src>
import functools

import jax
import jax.numpy as jnp
from jax.experimental import pallas as pl
from jax.experimental.pallas import tpu as pltpu


_TAPS = [(kh, kw) for kh in range(3) for kw in range(3)]


def _round_up(x, m):
    return (x + m - 1) // m * m


def _downstep_kernel(x_ref, w1_ref, b1_ref, w2_ref, b2_ref, o_ref,
                     p1_ref, p2_ref, *, width):
    """One image per grid step, channel-major & spatially flattened.

    x_ref : (1, Cin,  F)      F = H*W, row pitch = width
    w1_ref: (Cmid, 9*Cin_p)   contraction order (kh, kw, cin), channels zero-padded
    b1_ref: (Cmid, 1)
    w2_ref: (Cout, 9*Cmid_p)
    b2_ref: (Cout, 1)
    o_ref : (1, Cout, F)      only the top-left (H-4, W-4) block of each row is valid
    p1_ref: (9*Cin_p,  F)     VMEM im2col scratch, conv1
    p2_ref: (9*Cmid_p, F)     VMEM im2col scratch, conv2
    """
    _, cin, f = x_ref.shape
    cmid = w1_ref.shape[0]
    cout = w2_ref.shape[0]
    cin_p = p1_ref.shape[0] // 9
    cmid_p = p2_ref.shape[0] // 9
    # Largest slice length keeping every tap offset (<= 2*width+2) in bounds.
    # All valid output columns lie below it, so nothing real is lost.
    L = f - (2 * width + 2)

    x = x_ref[0]                                       # (Cin, F)

    # ---- conv1: im2col (K = 9*Cin_p) + single MXU matmul + bias + ReLU ----
    p1_ref[...] = jnp.zeros_like(p1_ref)               # zero pad rows / tail columns
    for r, (kh, kw) in enumerate(_TAPS):
        off = kh * width + kw
        p1_ref[r * cin_p:r * cin_p + cin, :L] = x[:, off:off + L]
    acc1 = jnp.dot(w1_ref[...], p1_ref[...], preferred_element_type=jnp.float32)
    mid = jnp.maximum(acc1 + b1_ref[...], 0.0)         # (Cmid, F) f32

    # ---- conv2: same structure on the (still width-pitched) intermediate ----
    p2_ref[...] = jnp.zeros_like(p2_ref)
    for r, (kh, kw) in enumerate(_TAPS):
        off = kh * width + kw
        p2_ref[r * cmid_p:r * cmid_p + cmid, :L] = mid[:, off:off + L]
    acc2 = jnp.dot(w2_ref[...], p2_ref[...], preferred_element_type=jnp.float32)
    out = jnp.maximum(acc2 + b2_ref[...], 0.0)         # (Cout, F)

    o_ref[0] = out.astype(o_ref.dtype)                 # lane-dense store (F >= 128)


def _pack_weight(w, cin_p):
    """torch (Cout, Cin, 3, 3) -> (Cout, 9*cin_p), contraction order (kh, kw, cin)."""
    cout, cin = w.shape[0], w.shape[1]
    w = jnp.transpose(w, (0, 2, 3, 1))                            # (Cout, 3, 3, Cin)
    w = jnp.pad(w, ((0, 0), (0, 0), (0, 0), (0, cin_p - cin)))
    return w.reshape(cout, 9 * cin_p)


@jax.jit
def downstep_pallas(x_nchw, w1, b1, w2, b2):
    """x_nchw: (N, Cin, H, W); w*: torch layout (Cout, Cin, 3, 3); b*: (Cout,)."""
    N, Cin, H, W = x_nchw.shape
    Cmid = w1.shape[0]
    Cout = w2.shape[0]
    F = H * W
    Cin_p = _round_up(Cin, 8)          # sublane-aligned im2col blocks
    Cmid_p = _round_up(Cmid, 8)
    K1, K2 = 9 * Cin_p, 9 * Cmid_p

    x_flat = x_nchw.reshape(N, Cin, F)                 # free reshape, NO transpose
    w1m = _pack_weight(w1, Cin_p)                      # (Cmid, K1)  tiny, once
    w2m = _pack_weight(w2, Cmid_p)                     # (Cout, K2)
    b1c = b1.reshape(Cmid, 1)
    b2c = b2.reshape(Cout, 1)

    out_flat = pl.pallas_call(
        functools.partial(_downstep_kernel, width=W),
        out_shape=jax.ShapeDtypeStruct((N, Cout, F), x_nchw.dtype),
        grid=(N,),
        in_specs=[
            pl.BlockSpec((1, Cin, F), lambda n: (n, 0, 0)),
            pl.BlockSpec((Cmid, K1), lambda n: (0, 0)),
            pl.BlockSpec((Cmid, 1), lambda n: (0, 0)),
            pl.BlockSpec((Cout, K2), lambda n: (0, 0)),
            pl.BlockSpec((Cout, 1), lambda n: (0, 0)),
        ],
        out_specs=pl.BlockSpec((1, Cout, F), lambda n: (n, 0, 0)),
        scratch_shapes=[
            pltpu.VMEM((K1, F), jnp.float32),
            pltpu.VMEM((K2, F), jnp.float32),
        ],
        compiler_params=pltpu.CompilerParams(
            dimension_semantics=("parallel",)),
    )(x_flat, w1m, b1c, w2m, b2c)

    # Valid region of the width-pitched flat output: rows [0, H-4), cols [0, W-4).
    return out_flat.reshape(N, Cout, H, W)[:, :, :H - 4, :W - 4]


def _reference(x, w1, b1, w2, b2):
    dn = ("NCHW", "OIHW", "NCHW")
    y = jax.lax.conv_general_dilated(x, w1, (1, 1), "VALID", dimension_numbers=dn)
    y = jnp.maximum(y + b1[None, :, None, None], 0.0)
    y = jax.lax.conv_general_dilated(y, w2, (1, 1), "VALID", dimension_numbers=dn)
    return jnp.maximum(y + b2[None, :, None, None], 0.0)


def _bf16_exact(a):
    # Quantize test data to bf16-representable f32 so any kernel-vs-reference delta
    # comes from accumulation order only, not from MXU bf16 operand rounding.
    return a.astype(jnp.bfloat16).astype(jnp.float32)


if __name__ == "__main__":
    key = jax.random.PRNGKey(0)
    kx, k1, k2, k3, k4 = jax.random.split(key, 5)

    N, inC, outC, H, W = 2, 4, 8, 16, 16

    x = _bf16_exact(jax.random.normal(kx, (N, inC, H, W), jnp.float32))
    w1 = _bf16_exact(jax.random.normal(k1, (outC, inC, 3, 3), jnp.float32) * 0.1)
    b1 = _bf16_exact(jax.random.normal(k2, (outC,), jnp.float32) * 0.1)
    w2 = _bf16_exact(jax.random.normal(k3, (outC, outC, 3, 3), jnp.float32) * 0.1)
    b2 = _bf16_exact(jax.random.normal(k4, (outC,), jnp.float32) * 0.1)

    out = downstep_pallas(x, w1, b1, w2, b2)
    out = jax.block_until_ready(out)

    ref = _reference(x, w1, b1, w2, b2)
    assert out.shape == (N, outC, H - 4, W - 4), out.shape
    err = float(jnp.max(jnp.abs(out - ref)))
    assert jnp.allclose(out, ref, atol=1e-3, rtol=1e-3), f"mismatch vs reference: {err}"

    print("KERNEL_OK")
</pallas_src>

<mosaic_0001>
module attributes {stable_mosaic.version = 11 : i64} {
  func.func @_downstep_kernel(%arg0: i32, %arg1: memref<1x4x256xf32, #tpu.memory_space<vmem>>, %arg2: memref<8x72xf32, #tpu.memory_space<vmem>>, %arg3: memref<8x1xf32, #tpu.memory_space<vmem>>, %arg4: memref<8x72xf32, #tpu.memory_space<vmem>>, %arg5: memref<8x1xf32, #tpu.memory_space<vmem>>, %arg6: memref<1x8x256xf32, #tpu.memory_space<vmem>>, %arg7: memref<72x256xf32, #tpu.memory_space<vmem>>, %arg8: memref<72x256xf32, #tpu.memory_space<vmem>>) attributes {dimension_semantics = [#tpu.dimension_semantics<parallel>], iteration_bounds = array<i64: 2>, scalar_prefetch = 0 : i64, scratch_operands = 2 : i64, tpu.core_type = #tpu.core_type<tc>, window_params = [{transform_indices = @transform_0, window_bounds = array<i64: 1, 4, 256>}, {pipeline_mode = #tpu.pipeline_mode<synchronous>, transform_indices = @transform_1, window_bounds = array<i64: 8, 72>}, {pipeline_mode = #tpu.pipeline_mode<synchronous>, transform_indices = @transform_2, window_bounds = array<i64: 8, 1>}, {pipeline_mode = #tpu.pipeline_mode<synchronous>, transform_indices = @transform_3, window_bounds = array<i64: 8, 72>}, {pipeline_mode = #tpu.pipeline_mode<synchronous>, transform_indices = @transform_4, window_bounds = array<i64: 8, 1>}, {transform_indices = @transform_5, window_bounds = array<i64: 1, 8, 256>}]} {
    %c0 = arith.constant 0 : index
    %c0_0 = arith.constant 0 : index
    %c0_1 = arith.constant 0 : index
    %0 = vector.load %arg1[%c0, %c0_0, %c0_1] : memref<1x4x256xf32, #tpu.memory_space<vmem>>, vector<1x4x256xf32>
    %1 = vector.shape_cast %0 : vector<1x4x256xf32> to vector<4x256xf32>
    %cst = arith.constant 0.000000e+00 : f32
    %2 = vector.broadcast %cst : f32 to vector<72x256xf32>
    %c0_2 = arith.constant 0 : index
    %c0_3 = arith.constant 0 : index
    %3 = vector.load %arg7[%c0_2, %c0_3] : memref<72x256xf32, #tpu.memory_space<vmem>>, vector<72x256xf32>
    tpu.vector_store %arg7[%c0_2, %c0_3], %2 {strides = array<i32>} : memref<72x256xf32, #tpu.memory_space<vmem>>, vector<72x256xf32>,
    %4 = vector.extract_strided_slice %1 {offsets = [0, 0], sizes = [4, 222], strides = [1, 1]} : vector<4x256xf32> to vector<4x222xf32>
    %c0_4 = arith.constant 0 : index
    %c0_5 = arith.constant 0 : index
    %5 = vector.load %arg7[%c0_4, %c0_5] : memref<72x256xf32, #tpu.memory_space<vmem>>, vector<4x222xf32>
    tpu.vector_store %arg7[%c0_4, %c0_5], %4 {strides = array<i32>} : memref<72x256xf32, #tpu.memory_space<vmem>>, vector<4x222xf32>,
    %6 = vector.extract_strided_slice %1 {offsets = [0, 1], sizes = [4, 222], strides = [1, 1]} : vector<4x256xf32> to vector<4x222xf32>
    %c8 = arith.constant 8 : index
    %c0_6 = arith.constant 0 : index
    %7 = vector.load %arg7[%c8, %c0_6] : memref<72x256xf32, #tpu.memory_space<vmem>>, vector<4x222xf32>
    tpu.vector_store %arg7[%c8, %c0_6], %6 {strides = array<i32>} : memref<72x256xf32, #tpu.memory_space<vmem>>, vector<4x222xf32>,
    %8 = vector.extract_strided_slice %1 {offsets = [0, 2], sizes = [4, 222], strides = [1, 1]} : vector<4x256xf32> to vector<4x222xf32>
    %c16 = arith.constant 16 : index
    %c0_7 = arith.constant 0 : index
    %9 = vector.load %arg7[%c16, %c0_7] : memref<72x256xf32, #tpu.memory_space<vmem>>, vector<4x222xf32>
    tpu.vector_store %arg7[%c16, %c0_7], %8 {strides = array<i32>} : memref<72x256xf32, #tpu.memory_space<vmem>>, vector<4x222xf32>,
    %10 = vector.extract_strided_slice %1 {offsets = [0, 16], sizes = [4, 222], strides = [1, 1]} : vector<4x256xf32> to vector<4x222xf32>
    %c24 = arith.constant 24 : index
    %c0_8 = arith.constant 0 : index
    %11 = vector.load %arg7[%c24, %c0_8] : memref<72x256xf32, #tpu.memory_space<vmem>>, vector<4x222xf32>
    tpu.vector_store %arg7[%c24, %c0_8], %10 {strides = array<i32>} : memref<72x256xf32, #tpu.memory_space<vmem>>, vector<4x222xf32>,
    %12 = vector.extract_strided_slice %1 {offsets = [0, 17], sizes = [4, 222], strides = [1, 1]} : vector<4x256xf32> to vector<4x222xf32>
    %c32 = arith.constant 32 : index
    %c0_9 = arith.constant 0 : index
    %13 = vector.load %arg7[%c32, %c0_9] : memref<72x256xf32, #tpu.memory_space<vmem>>, vector<4x222xf32>
    tpu.vector_store %arg7[%c32, %c0_9], %12 {strides = array<i32>} : memref<72x256xf32, #tpu.memory_space<vmem>>, vector<4x222xf32>,
    %14 = vector.extract_strided_slice %1 {offsets = [0, 18], sizes = [4, 222], strides = [1, 1]} : vector<4x256xf32> to vector<4x222xf32>
    %c40 = arith.constant 40 : index
    %c0_10 = arith.constant 0 : index
    %15 = vector.load %arg7[%c40, %c0_10] : memref<72x256xf32, #tpu.memory_space<vmem>>, vector<4x222xf32>
    tpu.vector_store %arg7[%c40, %c0_10], %14 {strides = array<i32>} : memref<72x256xf32, #tpu.memory_space<vmem>>, vector<4x222xf32>,
    %16 = vector.extract_strided_slice %1 {offsets = [0, 32], sizes = [4, 222], strides = [1, 1]} : vector<4x256xf32> to vector<4x222xf32>
    %c48 = arith.constant 48 : index
    %c0_11 = arith.constant 0 : index
    %17 = vector.load %arg7[%c48, %c0_11] : memref<72x256xf32, #tpu.memory_space<vmem>>, vector<4x222xf32>
    tpu.vector_store %arg7[%c48, %c0_11], %16 {strides = array<i32>} : memref<72x256xf32, #tpu.memory_space<vmem>>, vector<4x222xf32>,
    %18 = vector.extract_strided_slice %1 {offsets = [0, 33], sizes = [4, 222], strides = [1, 1]} : vector<4x256xf32> to vector<4x222xf32>
    %c56 = arith.constant 56 : index
    %c0_12 = arith.constant 0 : index
    %19 = vector.load %arg7[%c56, %c0_12] : memref<72x256xf32, #tpu.memory_space<vmem>>, vector<4x222xf32>
    tpu.vector_store %arg7[%c56, %c0_12], %18 {strides = array<i32>} : memref<72x256xf32, #tpu.memory_space<vmem>>, vector<4x222xf32>,
    %20 = vector.extract_strided_slice %1 {offsets = [0, 34], sizes = [4, 222], strides = [1, 1]} : vector<4x256xf32> to vector<4x222xf32>
    %c64 = arith.constant 64 : index
    %c0_13 = arith.constant 0 : index
    %21 = vector.load %arg7[%c64, %c0_13] : memref<72x256xf32, #tpu.memory_space<vmem>>, vector<4x222xf32>
    tpu.vector_store %arg7[%c64, %c0_13], %20 {strides = array<i32>} : memref<72x256xf32, #tpu.memory_space<vmem>>, vector<4x222xf32>,
    %c0_14 = arith.constant 0 : index
    %c0_15 = arith.constant 0 : index
    %22 = vector.load %arg2[%c0_14, %c0_15] : memref<8x72xf32, #tpu.memory_space<vmem>>, vector<8x72xf32>
    %c0_16 = arith.constant 0 : index
    %c0_17 = arith.constant 0 : index
    %23 = vector.load %arg7[%c0_16, %c0_17] : memref<72x256xf32, #tpu.memory_space<vmem>>, vector<72x256xf32>
    %cst_18 = arith.constant dense<0.000000e+00> : vector<8x256xf32>
    %24 = tpu.matmul %22, %23, %cst_18 {dimension_numbers = #tpu.dot_dimension_numbers<[1], [0], [0], [1], [0, 0, 1, 1], [], []>} : vector<8x72xf32>, vector<72x256xf32>, vector<8x256xf32> -> vector<8x256xf32>
    %c0_19 = arith.constant 0 : index
    %c0_20 = arith.constant 0 : index
    %25 = vector.load %arg3[%c0_19, %c0_20] : memref<8x1xf32, #tpu.memory_space<vmem>>, vector<8x1xf32>
    %26 = vector.broadcast %25 : vector<8x1xf32> to vector<8x256xf32>
    %27 = arith.addf %24, %26 : vector<8x256xf32>
    %cst_21 = arith.constant 0.000000e+00 : f32
    %28 = vector.broadcast %cst_21 : f32 to vector<8x256xf32>
    %29 = arith.maximumf %27, %28 : vector<8x256xf32>
    %cst_22 = arith.constant 0.000000e+00 : f32
    %30 = vector.broadcast %cst_22 : f32 to vector<72x256xf32>
    %c0_23 = arith.constant 0 : index
    %c0_24 = arith.constant 0 : index
    %31 = vector.load %arg8[%c0_23, %c0_24] : memref<72x256xf32, #tpu.memory_space<vmem>>, vector<72x256xf32>
    tpu.vector_store %arg8[%c0_23, %c0_24], %30 {strides = array<i32>} : memref<72x256xf32, #tpu.memory_space<vmem>>, vector<72x256xf32>,
    %32 = vector.extract_strided_slice %29 {offsets = [0, 0], sizes = [8, 222], strides = [1, 1]} : vector<8x256xf32> to vector<8x222xf32>
    %c0_25 = arith.constant 0 : index
    %c0_26 = arith.constant 0 : index
    %33 = vector.load %arg8[%c0_25, %c0_26] : memref<72x256xf32, #tpu.memory_space<vmem>>, vector<8x222xf32>
    tpu.vector_store %arg8[%c0_25, %c0_26], %32 {strides = array<i32>} : memref<72x256xf32, #tpu.memory_space<vmem>>, vector<8x222xf32>,
    %34 = vector.extract_strided_slice %29 {offsets = [0, 1], sizes = [8, 222], strides = [1, 1]} : vector<8x256xf32> to vector<8x222xf32>
    %c8_27 = arith.constant 8 : index
    %c0_28 = arith.constant 0 : index
    %35 = vector.load %arg8[%c8_27, %c0_28] : memref<72x256xf32, #tpu.memory_space<vmem>>, vector<8x222xf32>
    tpu.vector_store %arg8[%c8_27, %c0_28], %34 {strides = array<i32>} : memref<72x256xf32, #tpu.memory_space<vmem>>, vector<8x222xf32>,
    %36 = vector.extract_strided_slice %29 {offsets = [0, 2], sizes = [8, 222], strides = [1, 1]} : vector<8x256xf32> to vector<8x222xf32>
    %c16_29 = arith.constant 16 : index
    %c0_30 = arith.constant 0 : index
    %37 = vector.load %arg8[%c16_29, %c0_30] : memref<72x256xf32, #tpu.memory_space<vmem>>, vector<8x222xf32>
    tpu.vector_store %arg8[%c16_29, %c0_30], %36 {strides = array<i32>} : memref<72x256xf32, #tpu.memory_space<vmem>>, vector<8x222xf32>,
    %38 = vector.extract_strided_slice %29 {offsets = [0, 16], sizes = [8, 222], strides = [1, 1]} : vector<8x256xf32> to vector<8x222xf32>
    %c24_31 = arith.constant 24 : index
    %c0_32 = arith.constant 0 : index
    %39 = vector.load %arg8[%c24_31, %c0_32] : memref<72x256xf32, #tpu.memory_space<vmem>>, vector<8x222xf32>
    tpu.vector_store %arg8[%c24_31, %c0_32], %38 {strides = array<i32>} : memref<72x256xf32, #tpu.memory_space<vmem>>, vector<8x222xf32>,
    %40 = vector.extract_strided_slice %29 {offsets = [0, 17], sizes = [8, 222], strides = [1, 1]} : vector<8x256xf32> to vector<8x222xf32>
    %c32_33 = arith.constant 32 : index
    %c0_34 = arith.constant 0 : index
    %41 = vector.load %arg8[%c32_33, %c0_34] : memref<72x256xf32, #tpu.memory_space<vmem>>, vector<8x222xf32>
    tpu.vector_store %arg8[%c32_33, %c0_34], %40 {strides = array<i32>} : memref<72x256xf32, #tpu.memory_space<vmem>>, vector<8x222xf32>,
    %42 = vector.extract_strided_slice %29 {offsets = [0, 18], sizes = [8, 222], strides = [1, 1]} : vector<8x256xf32> to vector<8x222xf32>
    %c40_35 = arith.constant 40 : index
    %c0_36 = arith.constant 0 : index
    %43 = vector.load %arg8[%c40_35, %c0_36] : memref<72x256xf32, #tpu.memory_space<vmem>>, vector<8x222xf32>
    tpu.vector_store %arg8[%c40_35, %c0_36], %42 {strides = array<i32>} : memref<72x256xf32, #tpu.memory_space<vmem>>, vector<8x222xf32>,
    %44 = vector.extract_strided_slice %29 {offsets = [0, 32], sizes = [8, 222], strides = [1, 1]} : vector<8x256xf32> to vector<8x222xf32>
    %c48_37 = arith.constant 48 : index
    %c0_38 = arith.constant 0 : index
    %45 = vector.load %arg8[%c48_37, %c0_38] : memref<72x256xf32, #tpu.memory_space<vmem>>, vector<8x222xf32>
    tpu.vector_store %arg8[%c48_37, %c0_38], %44 {strides = array<i32>} : memref<72x256xf32, #tpu.memory_space<vmem>>, vector<8x222xf32>,
    %46 = vector.extract_strided_slice %29 {offsets = [0, 33], sizes = [8, 222], strides = [1, 1]} : vector<8x256xf32> to vector<8x222xf32>
    %c56_39 = arith.constant 56 : index
    %c0_40 = arith.constant 0 : index
    %47 = vector.load %arg8[%c56_39, %c0_40] : memref<72x256xf32, #tpu.memory_space<vmem>>, vector<8x222xf32>
    tpu.vector_store %arg8[%c56_39, %c0_40], %46 {strides = array<i32>} : memref<72x256xf32, #tpu.memory_space<vmem>>, vector<8x222xf32>,
    %48 = vector.extract_strided_slice %29 {offsets = [0, 34], sizes = [8, 222], strides = [1, 1]} : vector<8x256xf32> to vector<8x222xf32>
    %c64_41 = arith.constant 64 : index
    %c0_42 = arith.constant 0 : index
    %49 = vector.load %arg8[%c64_41, %c0_42] : memref<72x256xf32, #tpu.memory_space<vmem>>, vector<8x222xf32>
    tpu.vector_store %arg8[%c64_41, %c0_42], %48 {strides = array<i32>} : memref<72x256xf32, #tpu.memory_space<vmem>>, vector<8x222xf32>,
    %c0_43 = arith.constant 0 : index
    %c0_44 = arith.constant 0 : index
    %50 = vector.load %arg4[%c0_43, %c0_44] : memref<8x72xf32, #tpu.memory_space<vmem>>, vector<8x72xf32>
    %c0_45 = arith.constant 0 : index
    %c0_46 = arith.constant 0 : index
    %51 = vector.load %arg8[%c0_45, %c0_46] : memref<72x256xf32, #tpu.memory_space<vmem>>, vector<72x256xf32>
    %cst_47 = arith.constant dense<0.000000e+00> : vector<8x256xf32>
    %52 = tpu.matmul %50, %51, %cst_47 {dimension_numbers = #tpu.dot_dimension_numbers<[1], [0], [0], [1], [0, 0, 1, 1], [], []>} : vector<8x72xf32>, vector<72x256xf32>, vector<8x256xf32> -> vector<8x256xf32>
    %c0_48 = arith.constant 0 : index
    %c0_49 = arith.constant 0 : index
    %53 = vector.load %arg5[%c0_48, %c0_49] : memref<8x1xf32, #tpu.memory_space<vmem>>, vector<8x1xf32>
    %54 = vector.broadcast %53 : vector<8x1xf32> to vector<8x256xf32>
    %55 = arith.addf %52, %54 : vector<8x256xf32>
    %cst_50 = arith.constant 0.000000e+00 : f32
    %56 = vector.broadcast %cst_50 : f32 to vector<8x256xf32>
    %57 = arith.maximumf %55, %56 : vector<8x256xf32>
    %c0_51 = arith.constant 0 : index
    %c0_52 = arith.constant 0 : index
    %c0_53 = arith.constant 0 : index
    %58 = vector.load %arg6[%c0_51, %c0_52, %c0_53] : memref<1x8x256xf32, #tpu.memory_space<vmem>>, vector<1x8x256xf32>
    %59 = vector.shape_cast %58 : vector<1x8x256xf32> to vector<8x256xf32>
    %60 = vector.shape_cast %57 : vector<8x256xf32> to vector<1x8x256xf32>
    tpu.vector_store %arg6[%c0_51, %c0_52, %c0_53], %60 {strides = array<i32>} : memref<1x8x256xf32, #tpu.memory_space<vmem>>, vector<1x8x256xf32>,
    return
  }
  func.func @transform_0(%arg0: i32) -> (i32, i32, i32) {
    %c0_i32 = arith.constant 0 : i32
    %c0_i32_0 = arith.constant 0 : i32
    %c0_i32_1 = arith.constant 0 : i32
    return %arg0, %c0_i32, %c0_i32_0 : i32, i32, i32
  }
  func.func @transform_1(%arg0: i32) -> (i32, i32) {
    %c0_i32 = arith.constant 0 : i32
    %c0_i32_0 = arith.constant 0 : i32
    %c0_i32_1 = arith.constant 0 : i32
    return %c0_i32, %c0_i32_0 : i32, i32
  }
  func.func @transform_2(%arg0: i32) -> (i32, i32) {
    %c0_i32 = arith.constant 0 : i32
    %c0_i32_0 = arith.constant 0 : i32
    %c0_i32_1 = arith.constant 0 : i32
    return %c0_i32, %c0_i32_0 : i32, i32
  }
  func.func @transform_3(%arg0: i32) -> (i32, i32) {
    %c0_i32 = arith.constant 0 : i32
    %c0_i32_0 = arith.constant 0 : i32
    %c0_i32_1 = arith.constant 0 : i32
    return %c0_i32, %c0_i32_0 : i32, i32
  }
  func.func @transform_4(%arg0: i32) -> (i32, i32) {
    %c0_i32 = arith.constant 0 : i32
    %c0_i32_0 = arith.constant 0 : i32
    %c0_i32_1 = arith.constant 0 : i32
    return %c0_i32, %c0_i32_0 : i32, i32
  }
  func.func @transform_5(%arg0: i32) -> (i32, i32, i32) {
    %c0_i32 = arith.constant 0 : i32
    %c0_i32_0 = arith.constant 0 : i32
    %c0_i32_1 = arith.constant 0 : i32
    return %arg0, %c0_i32, %c0_i32_0 : i32, i32, i32
  }
}

</mosaic_0001>

<bundles_post_ra>
// kernel: downstep_pallas.1
= control target key start
LH: loop header
LB: loop body
LE: loop exit
PB: predicated region body
PF: predicated region fallthrough
CT: control target
= control target key end

     0   :  { %s734_s18 = smov 0   ;;  %s860_s0 = inlined_call_operand.vmem [shape: f32[2,4,256], index: 0, kind: input, shape index: {}]   ;;  %s861_s1 = inlined_call_operand.vmem [shape: f32[8,72], index: 1, kind: input, shape index: {}]   ;;  %s862_s2 = inlined_call_operand.vmem [shape: f32[8,1], index: 2, kind: input, shape index: {}]   ;;  %s863_s3 = inlined_call_operand.vmem [shape: f32[8,72], index: 3, kind: input, shape index: {}]   ;;  %s864_s4 = inlined_call_operand.vmem [shape: f32[8,1], index: 4, kind: input, shape index: {}]   ;;  %s865_s5 = inlined_call_operand.vmem [shape: f32[2,8,256], index: 5, kind: output, shape index: {}]  }
   0x1 LB: > { %s649_s19 = sadd.s32 4294967295, %s692_s18   ;;  %p653_p0 = scmp.ge.s32.totalorder %s692_s18, 1  ;;  %s692_s18 = sphi %s734_s18, %s15_s18  }
   0x2   : > { %p187_p1 = scmp.lt.s32.totalorder %s692_s18, 3 }
   0x4   : > { %p188_p2 = pnand %p653_p0, %p187_p1 }
   0x5   : > { %p215_p3 = scmp.lt.s32.totalorder (!%p188_p2), %s649_s19, 1  ;;  %s694_s24 = smov (!%p188_p2), 111  }
   0x6   : > { %191 = sbr.rel (%p188_p2) target bundleno = 665 (0x299), region = 40  ;;  %s695_s25 = smov (!%p188_p2), 110  }
   0x7   : > { %s696_s26 = smov (!%p188_p2), 96   ;;  %s697_s27 = smov (!%p188_p2), 95  }
   0x8   : > { %s699_s28 = smov (!%p188_p2), 94   ;;  %s700_s29 = smov (!%p188_p2), 112  }
   0x9   : > { %s701_s30 = smov (!%p188_p2), 127   ;;  %s702_s6 = smov (!%p188_p2), 126  }
   0xb   : > { %s867_s19 = smov (!%p215_p3, %s649_s19), 1  ;;  %v698_v17 = vmov 0.0   ;;  %vm251_vm0 = vcmask 764928   ;;  %vm299_vm1 = vcmask 908288   ;;  %vm325_vm2 = vcmask 785408   ;;  %v376_v34 = vld [vmem:[%s862_s2] sm:$0xff] }
   0xc   : > { %s664_s20 = sshll.u32 %s867_s19, 3  ;;  %235 = vst [vmem:[#allocation2 + $0x48] sm:$0xff] %v698_v17  ;;  %vm312_vm3 = vcmask 900096   ;;  %vm338_vm4 = vcmask 777216   ;;  %vm351_vm5 = vcmask 769024   ;;  %vm286_vm6 = vcmask 916480  }
   0xd   : > { %s219_s23 = scalar_lea.vmem %s860_s0, %s664_s20  ;;  %226 = vst [vmem:[#allocation2] sm:$0xff] %v698_v17  ;;  %v703_v35 = vmov 0   ;;  %vm273_vm7 = vcmask 1031168   ;;  %vm260_vm8 = vcmask 1039360   ;;  %vm382_vm9 = vcmask 588800   ;;  %s665_s15 = sshll.u32 %s867_s19, 4 }
   0xe   : > { %v225_v0 = vld [vmem:[%s219_s23] sm:$0xff]  ;;  %227 = vst [vmem:[#allocation2 + $0x8] sm:$0xff] %v698_v17  ;;  %684 = vset.pattern.permute.xlu1 %v703_v35  ;;  %685 = vset.pattern.permute.xlu0 %v703_v35  ;;  %s224_s20 = scalar_lea.vmem %s865_s5, %s665_s15 }
   0xf   : > { %245 = vst [vmem:[#allocation1] ss:$2 sm:$0xff] %v225_v0 }
  0x10   : > { %228 = vst [vmem:[#allocation2 + $0x10] sm:$0xff] %v698_v17 }
  0x11   : > { %229 = vst [vmem:[#allocation2 + $0x18] sm:$0xff] %v698_v17 }
  0x12   : > { %230 = vst [vmem:[#allocation2 + $0x20] sm:$0xff] %v698_v17 }
  0x13   : > { %231 = vst [vmem:[#allocation2 + $0x28] sm:$0xff] %v698_v17 }
  0x14   : > { %232 = vst [vmem:[#allocation2 + $0x30] sm:$0xff] %v698_v17 }
  0x15   : > { %233 = vst [vmem:[#allocation2 + $0x38] sm:$0xff] %v698_v17 }
  0x16   : > { %v748_v1 = vld.sshfl [vmem:[#allocation1] sm:$0xff pattern:$0x75316420]  ;;  %v750_v2 = vld.sshfl [vmem:[#allocation1 + $0x8] sm:$0xff pattern:$0x75316420] }
  0x17   : > { %253 = vst [vmem:[#allocation1] ss:$2 sm:$0xff] %v225_v0 }
  0x18   : > { %234 = vst [vmem:[#allocation2 + $0x40] sm:$0xff] %v698_v17 }
  0x19   : > { %236 = vst [vmem:[#allocation2 + $0x50] sm:$0xff] %v698_v17 }
  0x1a   : > { %237 = vst [vmem:[#allocation2 + $0x58] sm:$0xff] %v698_v17 }
  0x1b   : > { %238 = vst [vmem:[#allocation2 + $0x60] sm:$0xff] %v698_v17 }
  0x1c   : > { %239 = vst [vmem:[#allocation2 + $0x68] sm:$0xff] %v698_v17 }
  0x1d   : > { %240 = vst [vmem:[#allocation2 + $0x70] sm:$0xff] %v698_v17 }
  0x1e   : > { %v254_v3 = vld.sshfl [vmem:[#allocation1] sm:$0xff pattern:$0x75316420]  ;;  %v752_v4 = vld.sshfl [vmem:[#allocation1 + $0x8] sm:$0xff pattern:$0x75316420] }
  0x1f   : > { %266 = vst [vmem:[#allocation1] ss:$2 sm:$0xff] %v225_v0 }
  0x20   : > { %241 = vst [vmem:[#allocation2 + $0x78] sm:$0xff] %v698_v17 }
  0x21   : > { %242 = vst [vmem:[#allocation2 + $0x80] sm:$0xff] %v698_v17 }
  0x22   : > { %243 = vst [vmem:[#allocation2 + $0x88] sm:$0xff] %v698_v17 }
  0x23   : > { %429 = vst [vmem:[#allocation3 + $0x8] sm:$0xff] %v698_v17 }
  0x24   : > { %431 = vst [vmem:[#allocation3 + $0x18] sm:$0xff] %v698_v17 }
  0x25   : > { %433 = vst [vmem:[#allocation3 + $0x28] sm:$0xff] %v698_v17 }
  0x26   : > { %v754_v5 = vld.sshfl [vmem:[#allocation1] sm:$0xff pattern:$0x75316420]  ;;  %v268_v6 = vld.sshfl [vmem:[#allocation1 + $0x8] sm:$0xff pattern:$0x75316420] }
  0x27   : > { %279 = vst [vmem:[#allocation1] ss:$2 sm:$0xff] %v225_v0 }
  0x28   : > { %435 = vst [vmem:[#allocation3 + $0x38] sm:$0xff] %v698_v17 }
  0x29   : > { %437 = vst [vmem:[#allocation3 + $0x48] sm:$0xff] %v698_v17 }
  0x2a   : > { %439 = vst [vmem:[#allocation3 + $0x58] sm:$0xff] %v698_v17 }
  0x2b   : > { %441 = vst [vmem:[#allocation3 + $0x68] sm:$0xff] %v698_v17 }
  0x2c   : > { %443 = vst [vmem:[#allocation3 + $0x78] sm:$0xff] %v698_v17 }
  0x2d   : > { %445 = vst [vmem:[#allocation3 + $0x88] sm:$0xff] %v698_v17 }
  0x2e   : > { %v280_v7 = vld.sshfl [vmem:[#allocation1] sm:$0xff pattern:$0x75316420]  ;;  %v281_v8 = vld.sshfl [vmem:[#allocation1 + $0x8] sm:$0xff pattern:$0x75316420] }
  0x2f   : > { %292 = vst [vmem:[#allocation1] ss:$2 sm:$0xff] %v225_v0 }
  0x30   : > { %250 = vst [vmem:[#allocation2] sm:$0xf] %v748_v1 }
  0x31   : > { %252 = vst.msk [vmem:[#allocation2 + $0x8] sm:$0xf] %vm251_vm0, %v750_v2 }
  0x36   : > { %v294_v9 = vld.sshfl [vmem:[#allocation1 + $0x8] sm:$0xff pattern:$0x75316420]  ;;  %v293_v10 = vld.sshfl [vmem:[#allocation1] sm:$0xff pattern:$0x75316420] }
  0x37   : > { %297 = vrot.lane.b32.xlu0 %v294_v9, %s694_s24  ;;  %305 = vst [vmem:[#allocation1] ss:$2 sm:$0xff] %v225_v0  ;;  %295 = vrot.lane.b32.xlu2 %v293_v10, %s694_s24  ;;  %v358_v63 = vld [vmem:[#allocation2] sm:$0xff] }
  0x38   : > { %v359_v61 = vld [vmem:[#allocation2 + $0x8] sm:$0xff] }
  0x3e   : > { %v307_v11 = vld.sshfl [vmem:[#allocation1 + $0x8] sm:$0xff pattern:$0x75316420]  ;;  %v306_v12 = vld.sshfl [vmem:[#allocation1] sm:$0xff pattern:$0x75316420] }
  0x3f   : > { %310 = vrot.lane.b32.xlu1 %v307_v11, %s695_s25  ;;  %308 = vrot.lane.b32.xlu0 %v306_v12, %s695_s25  ;;  %318 = vst [vmem:[#allocation1] ss:$2 sm:$0xff] %v225_v0 }
  0x46   : > { %v319_v13 = vld.sshfl [vmem:[#allocation1] sm:$0xff pattern:$0x75316420]  ;;  %v320_v14 = vld.sshfl [vmem:[#allocation1 + $0x8] sm:$0xff pattern:$0x75316420] }
  0x47   : > { %331 = vst [vmem:[#allocation1] ss:$2 sm:$0xff] %v225_v0  ;;  %321 = vrot.lane.b32.xlu2 %v319_v13, %s696_s26 }
  0x4e   : > { %v332_v15 = vld.sshfl [vmem:[#allocation1] sm:$0xff pattern:$0x75316420]  ;;  %v333_v16 = vld.sshfl [vmem:[#allocation1 + $0x8] sm:$0xff pattern:$0x75316420] }
  0x4f   : > { %334 = vrot.lane.b32.xlu1 %v332_v15, %s697_s27  ;;  %344 = vst [vmem:[#allocation1] ss:$2 sm:$0xff] %v225_v0  ;;  %323 = vrot.lane.b32.xlu2 %v320_v14, %s696_s26  ;;  %v357_v0 = vld [vmem:[%s861_s1] sm:$0xff] }
  0x56   : > { %v345_v18 = vld.sshfl [vmem:[#allocation1] sm:$0xff pattern:$0x75316420]  ;;  %v346_v19 = vld.sshfl [vmem:[#allocation1 + $0x8] sm:$0xff pattern:$0x75316420] }
  0x57   : > { %336 = vrot.lane.b32.xlu1 %v333_v16, %s697_s27  ;;  %347 = vrot.lane.b32.xlu0 %v345_v18, %s699_s28 }
  0x58   : > { %284 = vrot.lane.b32.xlu2 %v281_v8, %s700_s29 }
  0x5f   : > { %282 = vrot.lane.b32.xlu1 %v280_v7, %s700_s29  ;;  %349 = vrot.lane.b32.xlu0 %v346_v19, %s699_s28 }
  0x60   : > { %256 = vrot.lane.b32.xlu2 %v254_v3, %s701_s30 }
  0x67   : > { %271 = vrot.lane.b32.xlu1 %v268_v6, %s702_s6  ;;  %269 = vrot.lane.b32.xlu0 %v754_v5, %s702_s6 }
  0x6f   : > { %258 = vrot.lane.b32.xlu0 %v752_v4, %s701_s30  ;;  %379 = vperm.xlu1 %684, %v376_v34  }
  0x91   : > { %v296_v20 = vpop.permute.xlu2 %295 }
  0xa1   : > { %v322_v21 = vpop.permute.xlu2 %321 }
  0xa9   : > { %v298_v22 = vpop.permute.xlu0 %297  ;;  %v324_v24 = vpop.permute.xlu2 %323 }
  0xaa   : > { %304 = vst.msk [vmem:[#allocation2 + $0x48] sm:$0xf] %vm251_vm0, %v298_v22  ;;  %v300_v23 = vsel %vm299_vm1, %v296_v20, %v298_v22  ;;  %v326_v25 = vsel %vm325_vm2, %v322_v21, %v324_v24  ;;  %v541_v22 = vld [vmem:[%s864_s4] sm:$0xff] }
  0xab   : > { %303 = vst [vmem:[#allocation2 + $0x40] sm:$0xf] %v300_v23 }
  0xac   : > { %330 = vst.msk [vmem:[#allocation2 + $0x68] sm:$0xf] %vm251_vm0, %v324_v24 }
  0xad   : > { %329 = vst [vmem:[#allocation2 + $0x60] sm:$0xf] %v326_v25 }
  0xb1   : > { %v311_v26 = vpop.permute.xlu1 %310  ;;  %v309_v27 = vpop.permute.xlu0 %308  ;;  %v367_v53 = vld [vmem:[#allocation2 + $0x48] sm:$0xff] }
  0xb2   : > { %317 = vst.msk [vmem:[#allocation2 + $0x58] sm:$0xf] %vm251_vm0, %v311_v26  ;;  %v313_v28 = vsel %vm312_vm3, %v309_v27, %v311_v26  ;;  %v285_v29 = vpop.permute.xlu2 %284  ;;  %v366_v56 = vld [vmem:[#allocation2 + $0x40] sm:$0xff] }
  0xb3   : > { %316 = vst [vmem:[#allocation2 + $0x50] sm:$0xf] %v313_v28  ;;  %v371_v46 = vld [vmem:[#allocation2 + $0x68] sm:$0xff] }
  0xb4   : > { %291 = vst.msk [vmem:[#allocation2 + $0x38] sm:$0xf] %vm251_vm0, %v285_v29  ;;  %v370_v48 = vld [vmem:[#allocation2 + $0x60] sm:$0xff] }
  0xb9   : > { %v369_v49 = vld [vmem:[#allocation2 + $0x58] sm:$0xff] }
  0xba   : > { %v257_v50 = vpop.permute.xlu2 %256  ;;  %v368_v51 = vld [vmem:[#allocation2 + $0x50] sm:$0xff] }
  0xbb   : > { %v365_v54 = vld [vmem:[#allocation2 + $0x38] sm:$0xff] }
  0xc1   : > { %v335_v30 = vpop.permute.xlu1 %334 }
  0xc9   : > { %v337_v31 = vpop.permute.xlu1 %336  ;;  %v348_v32 = vpop.permute.xlu0 %347 }
  0xca   : > { %v339_v33 = vsel %vm338_vm4, %v335_v30, %v337_v31  ;;  %343 = vst.msk [vmem:[#allocation2 + $0x78] sm:$0xf] %vm251_vm0, %v337_v31 }
  0xcb   : > { %342 = vst [vmem:[#allocation2 + $0x70] sm:$0xf] %v339_v33 }
  0xd1   : > { %v283_v36 = vpop.permute.xlu1 %282  ;;  %v350_v37 = vpop.permute.xlu0 %349  ;;  %v373_v45 = vld [vmem:[#allocation2 + $0x78] sm:$0xff] }
  0xd2   : > { %v352_v38 = vsel %vm351_vm5, %v348_v32, %v350_v37  ;;  %356 = vst.msk [vmem:[#allocation2 + $0x88] sm:$0xf] %vm251_vm0, %v350_v37  ;;  %v287_v39 = vsel %vm286_vm6, %v283_v36, %v285_v29  ;;  %v372_v47 = vld [vmem:[#allocation2 + $0x70] sm:$0xff] }
  0xd3   : > { %355 = vst [vmem:[#allocation2 + $0x80] sm:$0xf] %v352_v38 }
  0xd4   : > { %290 = vst [vmem:[#allocation2 + $0x30] sm:$0xf] %v287_v39  ;;  %v522_v39 = vld [vmem:[%s863_s3] sm:$0xff] }
  0xd9   : > { %v272_v40 = vpop.permute.xlu1 %271  ;;  %v270_v41 = vpop.permute.xlu0 %269  ;;  %v375_v42 = vld [vmem:[#allocation2 + $0x88] sm:$0xff] }
  0xda   : > { %278 = vst.msk [vmem:[#allocation2 + $0x28] sm:$0xf] %vm251_vm0, %v272_v40  ;;  %v274_v43 = vsel %vm273_vm7, %v270_v41, %v272_v40  ;;  %413 = vmatpush.msra.mxu1 %v375_v42  ;;  %v374_v44 = vld [vmem:[#allocation2 + $0x80] sm:$0xff] }
  0xdb   : > { %277 = vst [vmem:[#allocation2 + $0x20] sm:$0xf] %v274_v43  ;;  %393 = vmatpush.msra.mxu0 %v374_v44  ;;  %v364_v58 = vld [vmem:[#allocation2 + $0x30] sm:$0xff] }
  0xdc   : > { %414 = vmatpush.msra.mxu1 %v373_v45 }
  0xdd   : > { %394 = vmatpush.msra.mxu0 %v372_v47 }
  0xde   : > { %415 = vmatpush.msra.mxu1 %v371_v46 }
  0xdf   : > { %395 = vmatpush.msra.mxu0 %v370_v48 }
  0xe0   : > { %416 = vmatpush.msra.mxu1 %v369_v49 }
  0xe1   : > { %396 = vmatpush.msra.mxu0 %v368_v51  ;;  %v259_v52 = vpop.permute.xlu0 %258  ;;  %v363_v57 = vld [vmem:[#allocation2 + $0x28] sm:$0xff]  ;;  %v380_v1 = vpop.permute.xlu1 %379 }
  0xe2   : > { %v261_v55 = vsel %vm260_vm8, %v257_v50, %v259_v52  ;;  %265 = vst.msk [vmem:[#allocation2 + $0x18] sm:$0xf] %vm251_vm0, %v259_v52  ;;  %417 = vmatpush.msra.mxu1 %v367_v53  ;;  %v362_v59 = vld [vmem:[#allocation2 + $0x20] sm:$0xff] }
  0xe3   : > { %264 = vst [vmem:[#allocation2 + $0x10] sm:$0xf] %v261_v55  ;;  %397 = vmatpush.msra.mxu0 %v366_v56 }
  0xe4   : > { %418 = vmatpush.msra.mxu1 %v365_v54 }
  0xe5   : > { %398 = vmatpush.msra.mxu0 %v364_v58 }
  0xe6   : > { %419 = vmatpush.msra.mxu1 %v363_v57 }
  0xe7   : > { %399 = vmatpush.msra.mxu0 %v362_v59 }
  0xe9   : > { %v361_v60 = vld [vmem:[#allocation2 + $0x18] sm:$0xff] }
  0xea   : > { %420 = vmatpush.msra.mxu1 %v361_v60  ;;  %v360_v62 = vld [vmem:[#allocation2 + $0x10] sm:$0xff] }
  0xeb   : > { %400 = vmatpush.msra.mxu0 %v360_v62 }
  0xec   : > { %421 = vmatpush.msra.mxu1 %v359_v61 }
  0xed   : > { %401 = vmatpush.msra.mxu0 %v358_v63  ;;  %659 = vmatmul.msk.f32.vlgmr.msra.gmra.mxu1 %vm382_vm9, %v357_v0 }
  0xee   : > { %658 = vmatmul.msk.f32.vlgmr.msra.gmra.mxu0 %vm382_vm9, %v357_v0 }
 0x16a   : > { %v423_v2 = vpop.f32.mrf.mxu1 }
 0x16b   : > { %v424_v3 = vadd.f32 %v423_v2, %v380_v1  ;;  %v403_v4 = vpop.f32.mrf.mxu0 }
 0x16c   : > { %v404_v5 = vadd.f32 %v403_v4, %v380_v1 }
 0x16d   : > { %v427_v6 = vmax.f32 %v424_v3, 0.0 }
 0x16e   : > { %v801_v7 = vmax.f32 %v404_v5, 0.0 }
 0x16f   : > { %447 = vst.msk [vmem:[#allocation3 + $0x8] sm:$0xff] %vm351_vm5, %v427_v6  ;;  %497 = vrot.lane.b32.xlu1 %v427_v6, %s696_s26  ;;  %506 = vrot.lane.b32.xlu2 %v427_v6, %s697_s27 }
 0x170   : > { %515 = vrot.lane.b32.xlu0 %v427_v6, %s699_s28 }
 0x176   : > { %v524_v42 = vld [vmem:[#allocation3 + $0x8] sm:$0xff] }
 0x177   : > { %470 = vrot.lane.b32.xlu1 %v427_v6, %s700_s29  ;;  %479 = vrot.lane.b32.xlu2 %v427_v6, %s694_s24 }
 0x178   : > { %488 = vrot.lane.b32.xlu0 %v427_v6, %s695_s25 }
 0x17f   : > { %504 = vrot.lane.b32.xlu1 %v801_v7, %s697_s27  ;;  %513 = vrot.lane.b32.xlu2 %v801_v7, %s699_s28 }
 0x180   : > { %495 = vrot.lane.b32.xlu0 %v801_v7, %s696_s26 }
 0x187   : > { %477 = vrot.lane.b32.xlu1 %v801_v7, %s694_s24  ;;  %486 = vrot.lane.b32.xlu2 %v801_v7, %s695_s25 }
 0x188   : > { %468 = vrot.lane.b32.xlu0 %v801_v7, %s700_s29 }
 0x18f   : > { %450 = vrot.lane.b32.xlu1 %v801_v7, %s701_s30  ;;  %459 = vrot.lane.b32.xlu2 %v801_v7, %s702_s6 }
 0x190   : > { %461 = vrot.lane.b32.xlu0 %v427_v6, %s702_s6 }
 0x197   : > { %452 = vrot.lane.b32.xlu2 %v427_v6, %s701_s30 }
 0x198   : > { %544 = vperm.xlu0 %685, %v541_v22  }
 0x1c9   : > { %v507_v8 = vpop.permute.xlu2 %506 }
 0x1ca   : > { %512 = vst.msk [vmem:[#allocation3 + $0x78] sm:$0xff] %vm351_vm5, %v507_v8 }
 0x1d1   : > { %v480_v9 = vpop.permute.xlu2 %479  ;;  %v538_v20 = vld [vmem:[#allocation3 + $0x78] sm:$0xff] }
 0x1d2   : > { %485 = vst.msk [vmem:[#allocation3 + $0x48] sm:$0xff] %vm351_vm5, %v480_v9 }
 0x1d9   : > { %v514_v10 = vpop.permute.xlu2 %513  ;;  %v532_v29 = vld [vmem:[#allocation3 + $0x48] sm:$0xff] }
 0x1e1   : > { %v498_v11 = vpop.permute.xlu1 %497  ;;  %v487_v12 = vpop.permute.xlu2 %486 }
 0x1e2   : > { %503 = vst.msk [vmem:[#allocation3 + $0x68] sm:$0xff] %vm351_vm5, %v498_v11  ;;  %v516_v13 = vpop.permute.xlu0 %515 }
 0x1e3   : > { %v517_v14 = vsel %vm351_vm5, %v514_v10, %v516_v13  ;;  %521 = vst.msk [vmem:[#allocation3 + $0x88] sm:$0xff] %vm351_vm5, %v516_v13 }
 0x1e4   : > { %557 = vmatpush.msra.mxu2 %v517_v14 }
 0x1e9   : > { %v471_v15 = vpop.permute.xlu1 %470  ;;  %v460_v16 = vpop.permute.xlu2 %459  ;;  %v536_v21 = vld [vmem:[#allocation3 + $0x68] sm:$0xff] }
 0x1ea   : > { %476 = vst.msk [vmem:[#allocation3 + $0x38] sm:$0xff] %vm351_vm5, %v471_v15  ;;  %v489_v17 = vpop.permute.xlu0 %488  ;;  %v540_v18 = vld [vmem:[#allocation3 + $0x88] sm:$0xff] }
 0x1eb   : > { %v490_v19 = vsel %vm312_vm3, %v487_v12, %v489_v17  ;;  %494 = vst.msk [vmem:[#allocation3 + $0x58] sm:$0xff] %vm351_vm5, %v489_v17  ;;  %577 = vmatpush.msra.mxu3 %v540_v18 }
 0x1ed   : > { %578 = vmatpush.msra.mxu3 %v538_v20 }
 0x1ef   : > { %579 = vmatpush.msra.mxu3 %v536_v21 }
 0x1f1   : > { %v505_v23 = vpop.permute.xlu1 %504  ;;  %v453_v24 = vpop.permute.xlu2 %452  ;;  %v530_v30 = vld [vmem:[#allocation3 + $0x38] sm:$0xff] }
 0x1f2   : > { %v496_v25 = vpop.permute.xlu0 %495  ;;  %v508_v26 = vsel %vm338_vm4, %v505_v23, %v507_v8  ;;  %458 = vst.msk [vmem:[#allocation3 + $0x18] sm:$0xff] %vm351_vm5, %v453_v24  ;;  %v534_v27 = vld [vmem:[#allocation3 + $0x58] sm:$0xff] }
 0x1f3   : > { %v499_v28 = vsel %vm325_vm2, %v496_v25, %v498_v11  ;;  %580 = vmatpush.msra.mxu3 %v534_v27  ;;  %558 = vmatpush.msra.mxu2 %v508_v26 }
 0x1f5   : > { %581 = vmatpush.msra.mxu3 %v532_v29  ;;  %559 = vmatpush.msra.mxu2 %v499_v28 }
 0x1f7   : > { %582 = vmatpush.msra.mxu3 %v530_v30  ;;  %560 = vmatpush.msra.mxu2 %v490_v19 }
 0x1f9   : > { %v478_v31 = vpop.permute.xlu1 %477  ;;  %v526_v41 = vld [vmem:[#allocation3 + $0x18] sm:$0xff] }
 0x1fa   : > { %v469_v32 = vpop.permute.xlu0 %468  ;;  %v481_v33 = vsel %vm299_vm1, %v478_v31, %v480_v9 }
 0x1fb   : > { %v472_v34 = vsel %vm286_vm6, %v469_v32, %v471_v15  ;;  %561 = vmatpush.msra.mxu2 %v481_v33 }
 0x1fd   : > { %562 = vmatpush.msra.mxu2 %v472_v34 }
 0x201   : > { %v451_v35 = vpop.permute.xlu1 %450 }
 0x202   : > { %v462_v36 = vpop.permute.xlu0 %461  ;;  %v454_v37 = vsel %vm260_vm8, %v451_v35, %v453_v24 }
 0x203   : > { %v463_v38 = vsel %vm273_vm7, %v460_v16, %v462_v36  ;;  %467 = vst.msk [vmem:[#allocation3 + $0x28] sm:$0xff] %vm351_vm5, %v462_v36 }
 0x204   : > { %563 = vmatpush.msra.mxu2 %v463_v38 }
 0x206   : > { %564 = vmatpush.msra.mxu2 %v454_v37 }
 0x208   : > { %565 = vmatpush.msra.mxu2 %v801_v7 }
 0x209   : > { %660 = vmatmul.msk.f32.vlgmr.msra.gmra.mxu2 %vm382_vm9, %v522_v39 }
 0x20a   : > { %v528_v40 = vld [vmem:[#allocation3 + $0x28] sm:$0xff]  ;;  %v545_v43 = vpop.permute.xlu0 %544 }
 0x20b   : > { %583 = vmatpush.msra.mxu3 %v528_v40 }
 0x20d   : > { %584 = vmatpush.msra.mxu3 %v526_v41 }
 0x20f   : > { %585 = vmatpush.msra.mxu3 %v524_v42 }
 0x210   : > { %661 = vmatmul.msk.f32.vlgmr.msra.gmra.mxu3 %vm382_vm9, %v522_v39 }
 0x28c   : > { %v567_v44 = vpop.f32.mrf.mxu2 }
 0x28d   : > { %v568_v45 = vadd.f32 %v567_v44, %v545_v43 }
 0x28f   : > { %v590_v46 = vmax.f32 %v568_v45, 0.0 }
 0x291   : > { %592 = vst [vmem:[%s224_s20] sm:$0xff] %v590_v46 }
 0x293   : > { %v587_v47 = vpop.f32.mrf.mxu3 }
 0x294   : > { %v588_v48 = vadd.f32 %v587_v47, %v545_v43 }
 0x296   : > { %v591_v49 = vmax.f32 %v588_v48, 0.0 }
 0x298   : > { %593 = vst [vmem:[%s224_s20 + $0x8] sm:$0xff] %v591_v49 }
 0x299 PF: > { %s15_s18 = sadd.s32 1, %s692_s18  }
 0x29a   : > { %p12_p4 = scmp.ge.s32.totalorder %s15_s18, 4  }
 0x29c   :  { %14 = sbr.rel (!%p12_p4) target bundleno = 1 (0x1), region = 70 }

</bundles_post_ra>
